<compile_context>
chip_gen: v7x
topology: tpu7x:2x2x1
jax: 0.10.0
libtpu: 0.0.40
codegen_flags: <defaults>
</compile_context>

<pallas_src>
import jax
import jax.numpy as jnp
from jax.experimental import pallas as pl
from jax.experimental.pallas import tpu as pltpu


def se_kernel(x_ref, w1_ref, b1_ref, w2_ref, b2_ref, o_ref):
    """One batch tile per grid step.

    x_ref : (Bt, C, HW)  activations, HW on the lane axis (input dtype)
    w1_ref: (C, Cr)      fc1 weight, (in, out) == PyTorch weight.T  (f32)
    b1_ref: (1, Cr)      fc1 bias (f32)
    w2_ref: (Cr, C)      fc2 weight, (in, out)                      (f32)
    b2_ref: (1, C)       fc2 bias (f32)
    o_ref : (Bt, C, HW)  output (input dtype)
    """
    # Upcast once; all accumulation is f32 regardless of I/O dtype.
    x = x_ref[...].astype(jnp.float32)                         # (Bt, C, HW)

    # Squeeze: global average pool over the spatial (lane) axis.
    pooled = jnp.mean(x, axis=-1)                              # (Bt, C)

    # Excitation: Linear -> ReLU -> Linear -> h_sigmoid (two batched MXU matmuls).
    h = jnp.dot(pooled, w1_ref[...],
                preferred_element_type=jnp.float32) + b1_ref[...]
    h = jnp.maximum(h, 0.0)                                    # ReLU
    y = jnp.dot(h, w2_ref[...],
                preferred_element_type=jnp.float32) + b2_ref[...]
    y = jnp.clip(y + 3.0, 0.0, 6.0) * (1.0 / 6.0)              # h_sigmoid

    # Scale: broadcast the per-(batch,channel) gate over all spatial lanes.
    o_ref[...] = (x * y[:, :, None]).astype(o_ref.dtype)       # (Bt, C, HW)


def se_forward(x_nchw, w1, b1, w2, b2, *, target_block_bytes=2 << 20):
    """x_nchw: (B, C, H, W). Returns (B, C, H, W) in the input dtype.

    Weights follow the (in, out) convention, i.e. PyTorch nn.Linear weight.T.
    """
    B, C, H, W = x_nchw.shape
    HW = H * W
    Cr = w1.shape[1]
    # Loud check of the weight-layout convention (would be silent if C == Cr).
    assert w1.shape == (C, Cr), f"w1 must be (C, C//r)=(in,out), got {w1.shape}"
    assert w2.shape == (Cr, C), f"w2 must be (C//r, C)=(in,out), got {w2.shape}"
    assert b1.shape == (Cr,) and b2.shape == (C,)

    x3 = x_nchw.reshape(B, C, HW)                 # reshape only, no transpose
    io_dtype = x3.dtype
    w1f = w1.astype(jnp.float32)
    w2f = w2.astype(jnp.float32)
    b1_2d = b1.reshape(1, Cr).astype(jnp.float32)
    b2_2d = b2.reshape(1, C).astype(jnp.float32)

    # ---- Batch-tile size heuristic -----------------------------------------
    row_bytes = C * HW * x3.dtype.itemsize
    Bt = int(max(1, min(B, target_block_bytes // max(row_bytes, 1))))
    # v7x megacore: keep >=2 disjoint "parallel" blocks when each per-core
    # block is still sizeable; otherwise one big block is cheaper on the
    # single-TC v5e/v6e (fewer ~0.35 us grid steps).
    if B >= 2 and B % 2 == 0 and (B // 2) * row_bytes >= (512 << 10):
        Bt = min(Bt, B // 2)
    # Shrink to a divisor of B to avoid a ragged final block.
    while B % Bt:
        Bt -= 1
    num_steps = B // Bt

    # Weights/biases are constant across grid steps; when there is more than
    # one step, a single pipeline buffer avoids wasted VMEM / DMA bookkeeping.
    const_kwargs = {}
    if num_steps > 1:
        const_kwargs = dict(pipeline_mode=pl.Buffered(1))

    grid_spec = pltpu.PrefetchScalarGridSpec(
        num_scalar_prefetch=0,
        grid=(num_steps,),
        in_specs=[
            pl.BlockSpec((Bt, C, HW), lambda b: (b, 0, 0)),             # x
            pl.BlockSpec((C, Cr), lambda b: (0, 0), **const_kwargs),    # fc1 W
            pl.BlockSpec((1, Cr), lambda b: (0, 0), **const_kwargs),    # fc1 b
            pl.BlockSpec((Cr, C), lambda b: (0, 0), **const_kwargs),    # fc2 W
            pl.BlockSpec((1, C), lambda b: (0, 0), **const_kwargs),     # fc2 b
        ],
        out_specs=pl.BlockSpec((Bt, C, HW), lambda b: (b, 0, 0)),
    )

    out = pl.pallas_call(
        se_kernel,
        out_shape=jax.ShapeDtypeStruct((B, C, HW), io_dtype),
        grid_spec=grid_spec,
        compiler_params=pltpu.CompilerParams(
            dimension_semantics=("parallel",)),   # v7x: shard batch blocks over 2 TCs
    )(x3, w1f, b1_2d, w2f, b2_2d)

    return out.reshape(B, C, H, W)


def reference_forward(x_nchw, w1, b1, w2, b2):
    """Pure-JAX reference of the PyTorch SELayer forward (for verification)."""
    xf = x_nchw.astype(jnp.float32)
    pooled = jnp.mean(xf, axis=(2, 3))                         # (B, C)
    h = jnp.maximum(pooled @ w1 + b1, 0.0)                     # Linear + ReLU
    y = h @ w2 + b2                                            # Linear
    y = jnp.clip(y + 3.0, 0.0, 6.0) / 6.0                      # h_sigmoid
    return xf * y[:, :, None, None]


if __name__ == "__main__":
    B, C, H, W = 2, 32, 16, 16        # batch=2, channel=32, spatial=16x16
    RED = 4                           # reduction=4 -> hidden 8
    Cr = C // RED

    key = jax.random.PRNGKey(0)
    kx, k1, k2, k3, k4 = jax.random.split(key, 5)
    x = jax.random.normal(kx, (B, C, H, W), jnp.float32)
    # Weights stored as (in, out); equivalent to PyTorch nn.Linear weight.T.
    w1 = 0.1 * jax.random.normal(k1, (C, Cr), jnp.float32)
    b1 = 0.1 * jax.random.normal(k2, (Cr,), jnp.float32)
    w2 = 0.1 * jax.random.normal(k3, (Cr, C), jnp.float32)
    b2 = 0.1 * jax.random.normal(k4, (C,), jnp.float32)

    # --- f32 I/O path --------------------------------------------------------
    out = jax.block_until_ready(se_forward(x, w1, b1, w2, b2))
    ref = jax.block_until_ready(reference_forward(x, w1, b1, w2, b2))
    assert out.shape == (B, C, H, W), out.shape
    assert out.dtype == x.dtype, out.dtype
    err = float(jnp.max(jnp.abs(out - ref)))
    if err > 1e-5:
        raise AssertionError(f"f32 kernel mismatch vs reference: max abs err {err}")

    # --- bf16 I/O path (f32 accumulation inside, bf16 stores) ---------------
    x_bf16 = x.astype(jnp.bfloat16)
    out_bf16 = jax.block_until_ready(se_forward(x_bf16, w1, b1, w2, b2))
    assert out_bf16.dtype == jnp.bfloat16, out_bf16.dtype
    ref_bf16 = reference_forward(x_bf16, w1, b1, w2, b2)       # f32 reference on bf16 input
    err_bf = float(jnp.max(jnp.abs(out_bf16.astype(jnp.float32) - ref_bf16)))
    if err_bf > 5e-2:
        raise AssertionError(f"bf16 kernel mismatch vs reference: max abs err {err_bf}")

    print("KERNEL_OK")
</pallas_src>

<mosaic_0001>
module attributes {stable_mosaic.version = 11 : i64} {
  func.func @se_kernel(%arg0: i32, %arg1: memref<2x32x256xf32, #tpu.memory_space<vmem>>, %arg2: memref<32x8xf32, #tpu.memory_space<vmem>>, %arg3: memref<1x8xf32, #tpu.memory_space<vmem>>, %arg4: memref<8x32xf32, #tpu.memory_space<vmem>>, %arg5: memref<1x32xf32, #tpu.memory_space<vmem>>, %arg6: memref<2x32x256xf32, #tpu.memory_space<vmem>>) attributes {dimension_semantics = [#tpu.dimension_semantics<parallel>], iteration_bounds = array<i64: 1>, scalar_prefetch = 0 : i64, scratch_operands = 0 : i64, tpu.core_type = #tpu.core_type<tc>, window_params = [{transform_indices = @transform_0, window_bounds = array<i64: 2, 32, 256>}, {pipeline_mode = #tpu.pipeline_mode<synchronous>, transform_indices = @transform_1, window_bounds = array<i64: 32, 8>}, {pipeline_mode = #tpu.pipeline_mode<synchronous>, transform_indices = @transform_2, window_bounds = array<i64: 1, 8>}, {pipeline_mode = #tpu.pipeline_mode<synchronous>, transform_indices = @transform_3, window_bounds = array<i64: 8, 32>}, {pipeline_mode = #tpu.pipeline_mode<synchronous>, transform_indices = @transform_4, window_bounds = array<i64: 1, 32>}, {transform_indices = @transform_5, window_bounds = array<i64: 2, 32, 256>}]} {
    %c0 = arith.constant 0 : index
    %c0_0 = arith.constant 0 : index
    %c0_1 = arith.constant 0 : index
    %0 = vector.load %arg1[%c0, %c0_0, %c0_1] : memref<2x32x256xf32, #tpu.memory_space<vmem>>, vector<2x32x256xf32>
    %cst = arith.constant dense<0.000000e+00> : vector<2x32xf32>
    %1 = vector.multi_reduction <add>, %0, %cst [2] : vector<2x32x256xf32> to vector<2x32xf32>
    %cst_2 = arith.constant 2.560000e+02 : f32
    %2 = vector.broadcast %cst_2 : f32 to vector<2x32xf32>
    %3 = arith.divf %1, %2 : vector<2x32xf32>
    %c0_3 = arith.constant 0 : index
    %c0_4 = arith.constant 0 : index
    %4 = vector.load %arg2[%c0_3, %c0_4] : memref<32x8xf32, #tpu.memory_space<vmem>>, vector<32x8xf32>
    %cst_5 = arith.constant dense<0.000000e+00> : vector<2x8xf32>
    %5 = tpu.matmul %3, %4, %cst_5 {dimension_numbers = #tpu.dot_dimension_numbers<[1], [0], [0], [1], [0, 0, 1, 1], [], []>} : vector<2x32xf32>, vector<32x8xf32>, vector<2x8xf32> -> vector<2x8xf32>
    %c0_6 = arith.constant 0 : index
    %c0_7 = arith.constant 0 : index
    %6 = vector.load %arg3[%c0_6, %c0_7] : memref<1x8xf32, #tpu.memory_space<vmem>>, vector<1x8xf32>
    %7 = vector.broadcast %6 : vector<1x8xf32> to vector<2x8xf32>
    %8 = arith.addf %5, %7 : vector<2x8xf32>
    %cst_8 = arith.constant 0.000000e+00 : f32
    %9 = vector.broadcast %cst_8 : f32 to vector<2x8xf32>
    %10 = arith.maximumf %8, %9 : vector<2x8xf32>
    %c0_9 = arith.constant 0 : index
    %c0_10 = arith.constant 0 : index
    %11 = vector.load %arg4[%c0_9, %c0_10] : memref<8x32xf32, #tpu.memory_space<vmem>>, vector<8x32xf32>
    %cst_11 = arith.constant dense<0.000000e+00> : vector<2x32xf32>
    %12 = tpu.matmul %10, %11, %cst_11 {dimension_numbers = #tpu.dot_dimension_numbers<[1], [0], [0], [1], [0, 0, 1, 1], [], []>} : vector<2x8xf32>, vector<8x32xf32>, vector<2x32xf32> -> vector<2x32xf32>
    %c0_12 = arith.constant 0 : index
    %c0_13 = arith.constant 0 : index
    %13 = vector.load %arg5[%c0_12, %c0_13] : memref<1x32xf32, #tpu.memory_space<vmem>>, vector<1x32xf32>
    %14 = vector.broadcast %13 : vector<1x32xf32> to vector<2x32xf32>
    %15 = arith.addf %12, %14 : vector<2x32xf32>
    %cst_14 = arith.constant 3.000000e+00 : f32
    %16 = vector.broadcast %cst_14 : f32 to vector<2x32xf32>
    %17 = arith.addf %15, %16 : vector<2x32xf32>
    %cst_15 = arith.constant 0.000000e+00 : f32
    %cst_16 = arith.constant 6.000000e+00 : f32
    %18 = vector.broadcast %cst_15 : f32 to vector<2x32xf32>
    %19 = arith.maximumf %18, %17 : vector<2x32xf32>
    %20 = vector.broadcast %cst_16 : f32 to vector<2x32xf32>
    %21 = arith.minimumf %20, %19 : vector<2x32xf32>
    %cst_17 = arith.constant 0.166666672 : f32
    %22 = vector.broadcast %cst_17 : f32 to vector<2x32xf32>
    %23 = arith.mulf %21, %22 : vector<2x32xf32>
    %24 = vector.shape_cast %23 : vector<2x32xf32> to vector<2x32x1xf32>
    %25 = vector.broadcast %24 : vector<2x32x1xf32> to vector<2x32x256xf32>
    %26 = arith.mulf %0, %25 : vector<2x32x256xf32>
    %c0_18 = arith.constant 0 : index
    %c0_19 = arith.constant 0 : index
    %c0_20 = arith.constant 0 : index
    %27 = vector.load %arg6[%c0_18, %c0_19, %c0_20] : memref<2x32x256xf32, #tpu.memory_space<vmem>>, vector<2x32x256xf32>
    tpu.vector_store %arg6[%c0_18, %c0_19, %c0_20], %26 {strides = array<i32>} : memref<2x32x256xf32, #tpu.memory_space<vmem>>, vector<2x32x256xf32>,
    return
  }
  func.func @transform_0(%arg0: i32) -> (i32, i32, i32) {
    %c0_i32 = arith.constant 0 : i32
    %c0_i32_0 = arith.constant 0 : i32
    %c0_i32_1 = arith.constant 0 : i32
    return %arg0, %c0_i32, %c0_i32_0 : i32, i32, i32
  }
  func.func @transform_1(%arg0: i32) -> (i32, i32) {
    %c0_i32 = arith.constant 0 : i32
    %c0_i32_0 = arith.constant 0 : i32
    %c0_i32_1 = arith.constant 0 : i32
    return %c0_i32, %c0_i32_0 : i32, i32
  }
  func.func @transform_2(%arg0: i32) -> (i32, i32) {
    %c0_i32 = arith.constant 0 : i32
    %c0_i32_0 = arith.constant 0 : i32
    %c0_i32_1 = arith.constant 0 : i32
    return %c0_i32, %c0_i32_0 : i32, i32
  }
  func.func @transform_3(%arg0: i32) -> (i32, i32) {
    %c0_i32 = arith.constant 0 : i32
    %c0_i32_0 = arith.constant 0 : i32
    %c0_i32_1 = arith.constant 0 : i32
    return %c0_i32, %c0_i32_0 : i32, i32
  }
  func.func @transform_4(%arg0: i32) -> (i32, i32) {
    %c0_i32 = arith.constant 0 : i32
    %c0_i32_0 = arith.constant 0 : i32
    %c0_i32_1 = arith.constant 0 : i32
    return %c0_i32, %c0_i32_0 : i32, i32
  }
  func.func @transform_5(%arg0: i32) -> (i32, i32, i32) {
    %c0_i32 = arith.constant 0 : i32
    %c0_i32_0 = arith.constant 0 : i32
    %c0_i32_1 = arith.constant 0 : i32
    return %arg0, %c0_i32, %c0_i32_0 : i32, i32, i32
  }
}

</mosaic_0001>

<bundles_post_ra>
// kernel: tpu_custom_call.1
= control target key start
LH: loop header
LB: loop body
LE: loop exit
PB: predicated region body
PF: predicated region fallthrough
CT: control target
= control target key end

     0   :  { %10 = vsyncpa [#allocation3], 0  ;;  %s646_s0 = inlined_call_operand.hbm [shape: f32[2,32,256], index: 0, kind: input, shape index: {}]   ;;  %s647_s1 = inlined_call_operand.vmem [shape: f32[32,8], index: 1, kind: input, shape index: {}]   ;;  %s648_s2 = inlined_call_operand.vmem [shape: f32[1,8], index: 2, kind: input, shape index: {}]   ;;  %s649_s3 = inlined_call_operand.vmem [shape: f32[8,32], index: 3, kind: input, shape index: {}]   ;;  %s650_s4 = inlined_call_operand.vmem [shape: f32[1,32], index: 4, kind: input, shape index: {}]   ;;  %s651_s5 = inlined_call_operand.hbm [shape: f32[2,32,256], index: 5, kind: output, shape index: {}]  }
   0x1   :  { %11 = vsyncpa [#allocation4], 0  ;;  %s486_s18 = smov [#allocation2]   ;;  %s438_s22 = scalar_lea.hbm %s646_s0, 2048 }
   0x2   :  { %s17_s19 = sshll.u32 %s486_s18, 4  ;;  %p439_p0 = scmp.ne.s32.totalorder %s646_s0, %s438_s22  ;;  %s18_s19 = int_to_ptr.vmem [resolvable:$true] %s17_s19 }
   0x3   :  { %p442_p1 = scmp.lt.u32.totalorder %s438_s22, %s646_s0 }
   0x5   :  { %p444_p2 = pnand %p442_p1, %p439_p0 }
   0x7   :  { %447 = shalt.err (!%p444_p2)
}
   0x8   :  { %s448_s27 = scalar_lea.vmem %s18_s19, 2048  ;;  %p453_p4 = scmp.lt.s32.totalorder %s18_s19, %s18_s19 }
   0x9   :  { %p449_p3 = scmp.ne.s32.totalorder %s18_s19, %s448_s27  ;;  %p454_p5 = scmp.lt.s32.totalorder %s448_s27, %s448_s27 }
   0xb   :  { %p455_p6 = por %p454_p5, %p453_p4 }
   0xd   :  { %p456_p7 = pnand %p455_p6, %p449_p3 }
   0xf   :  { %459 = shalt.err (!%p456_p7)
}
  0x10   :  { %s487_s28 = smov 256   ;;  %s488_s29 = smov 16  }
  0x11   :  { %23 = dma.hbm_to_vmem [thread:$0]  %s646_s0, 2048, %s18_s19, [#allocation3], %s487_s28, %s487_s28, %s488_s29  }
  0x12   :  { %482 = dma.done.wait [#allocation3], 2048  }
  0x13   :  { %483 = vsyncadd [#allocation3], 4294965248  ;;  %v538_v0 = vld [vmem:[#allocation2 + $0x40] sm:$0xff]  ;;  %v540_v1 = vld [vmem:[#allocation2 + $0x48] sm:$0xff]  ;;  %v489_v27 = vmov 0.0|0.0   ;;  %vm490_vm0 = vmmov 0   ;;  %v103_v32 = vlaneseq }
  0x14   :  { %v542_v2 = vld [vmem:[#allocation2] sm:$0xff]  ;;  %v63_v3 = vadd.f32 %v540_v1, %v538_v0  ;;  %v546_v4 = vld [vmem:[#allocation2 + $0x8] sm:$0xff]  ;;  %v548_v5 = vld [vmem:[#allocation2 + $0x50] sm:$0xff]  ;;  %425 = vmatprep.subr.bf16.mxu0 %v489_v27  ;;  %v491_v31 = vmov 0.0   ;;  %vm114_vm1 = vcmask 130112   ;;  %vm121_vm2 = vcmask 195712  }
  0x15   :  { %v550_v6 = vld [vmem:[#allocation2 + $0x58] sm:$0xff]  ;;  %v51_v7 = vadd.f32 %v546_v4, %v542_v2  ;;  %v554_v8 = vld [vmem:[#allocation2 + $0x10] sm:$0xff]  ;;  %v562_v12 = vld [vmem:[#allocation2 + $0x60] sm:$0xff]  ;;  %417 = vmatprep.mubr.msk.f32.mxu0 %vm490_vm0, %v491_v31  ;;  %420 = vmatprep.subr.mxu1 %v491_v31  ;;  %v104_v34 = vand.u32 127, %v103_v32  ;;  %v598_v39 = vshrl.u32 %v103_v32, 7  ;;  %vm128_vm3 = vcmask 261312  }
  0x16   :  { %v556_v9 = vld [vmem:[#allocation2 + $0x18] sm:$0xff]  ;;  %64 = vadd.xlane.f32.xlu1 %v63_v3  ;;  %v66_v10 = vadd.f32 %v550_v6, %v548_v5  ;;  %v564_v13 = vld [vmem:[#allocation2 + $0x68] sm:$0xff]  ;;  %v566_v14 = vld [vmem:[#allocation2 + $0x20] sm:$0xff]  ;;  %422 = vmatprep.mubr.msk.f32.mxu1 %vm490_vm0, %v491_v31  ;;  %vm149_vm4 = vcmask 1041409   ;;  %vm151_vm5 = vcmask 261120   ;;  %vm233_vm6 = vcmask 64512  }
  0x17   :  { %52 = vadd.xlane.f32.xlu0 %v51_v7  ;;  %v54_v11 = vadd.f32 %v556_v9, %v554_v8  ;;  %v568_v15 = vld [vmem:[#allocation2 + $0x28] sm:$0xff]  ;;  %v69_v16 = vadd.f32 %v564_v13, %v562_v12  ;;  %v574_v18 = vld [vmem:[#allocation2 + $0x70] sm:$0xff]  ;;  %v576_v19 = vld [vmem:[#allocation2 + $0x78] sm:$0xff]  ;;  %v109_v36 = vadd.s32 4294967288, %v104_v34  ;;  %v116_v38 = vadd.s32 4294967280, %v104_v34 }
  0x18   :  { %v57_v17 = vadd.f32 %v568_v15, %v566_v14  ;;  %v578_v20 = vld [vmem:[#allocation2 + $0x30] sm:$0xff]  ;;  %v580_v21 = vld [vmem:[#allocation2 + $0x38] sm:$0xff]  ;;  %v72_v22 = vadd.f32 %v576_v19, %v574_v18  ;;  %v84_v24 = vld [vmem:[%s647_s1] sm:$0xff]  ;;  %v123_v43 = vadd.s32 4294967272, %v104_v34  ;;  %v107_v47 = vsub.s32 %v104_v34, %v598_v39 }
  0x19   :  { %v60_v23 = vadd.f32 %v580_v21, %v578_v20  ;;  %v85_v25 = vld [vmem:[%s647_s1 + $0x8] sm:$0xff]  ;;  %v86_v28 = vld [vmem:[%s647_s1 + $0x10] sm:$0xff]  ;;  %v87_v29 = vld [vmem:[%s647_s1 + $0x18] sm:$0xff]  ;;  %v112_v41 = vsub.s32 %v109_v36, %v598_v39  ;;  %v119_v45 = vsub.s32 %v116_v38, %v598_v39  ;;  %v313_v38 = vsub.s32 0, %v598_v39 }
  0x1a   :  { %67 = vadd.xlane.f32.xlu1 %v66_v10  ;;  %v426_v26 = vpack.c.bf16 %v85_v25, %v84_v24  ;;  %v429_v30 = vpack.c.bf16 %v87_v29, %v86_v28  ;;  %v126_v54 = vsub.s32 %v123_v43, %v598_v39  ;;  %v225_v25 = vld [vmem:[%s649_s3] sm:$0xff] }
  0x1b   :  { %55 = vadd.xlane.f32.xlu0 %v54_v11  ;;  %421 = vmatpush3.msra.mxu1 %v225_v25  ;;  %v400_v31 = vld [vmem:[%s650_s4] ss:$0 sm:$0xff] }
  0x1c   :  { %427 = vmatpush3.bf16.msra.mxu0 %v426_v26  ;;  %v398_v26 = vld [vmem:[%s648_s2] ss:$0 sm:$0xff]  ;;  %s492_s2 = smov [#allocation5]  }
  0x1d   :  { %428 = vmatprep.subr.bf16.mxu0 %v489_v27  ;;  %s386_s3 = sshll.u32 %s492_s2, 4  ;;  %s387_s3 = int_to_ptr.vmem [resolvable:$true] %s386_s3 }
  0x1e   :  { %70 = vadd.xlane.f32.xlu1 %v69_v16  ;;  %s460_s4 = scalar_lea.vmem %s387_s3, 2048  ;;  %p465_p9 = scmp.lt.s32.totalorder %s387_s3, %s387_s3 }
  0x1f   :  { %58 = vadd.xlane.f32.xlu0 %v57_v17  ;;  %p461_p8 = scmp.ne.s32.totalorder %s387_s3, %s460_s4  ;;  %p466_p10 = scmp.lt.s32.totalorder %s460_s4, %s460_s4 }
  0x20   :  { %430 = vmatpush3.bf16.msra.mxu0 %v429_v30 }
  0x21   :  { %p467_p11 = por %p466_p10, %p465_p9 }
  0x22   :  { %73 = vadd.xlane.f32.xlu1 %v72_v22 }
  0x23   :  { %61 = vadd.xlane.f32.xlu0 %v60_v23  ;;  %p468_p12 = pnand %p467_p11, %p461_p8 }
  0xa3   :  { %v65_v33 = vpop.xlane.xlu1 %64 }
  0xa4   :  { %v53_v35 = vpop.xlane.xlu0 %52  ;;  %v80_v48 = vmul.f32 0.00390625, %v65_v33 }
  0xa5   :  { %v76_v51 = vmul.f32 0.00390625, %v53_v35 }
  0xa6   :  { %v133_v58 = vrot.slane %v80_v48, %v107_v47 }
  0xa7   :  { %v68_v37 = vpop.xlane.xlu1 %67  ;;  %v108_v62 = vrot.slane %v76_v51, %v107_v47 }
  0xa8   :  { %v56_v40 = vpop.xlane.xlu0 %55  ;;  %v81_v42 = vmul.f32 0.00390625, %v68_v37 }
  0xa9   :  { %v77_v44 = vmul.f32 0.00390625, %v56_v40 }
  0xaa   :  { %v137_v53 = vrot.slane %v81_v42, %v112_v41  ;;  %v332_v42 = vsub.s32 1, %v598_v39 }
  0xab   :  { %v71_v46 = vpop.xlane.xlu1 %70  ;;  %v113_v55 = vrot.slane %v77_v44, %v112_v41 }
  0xac   :  { %v82_v49 = vmul.f32 0.00390625, %v71_v46  ;;  %v59_v50 = vpop.xlane.xlu0 %58  ;;  %v138_v3 = vsel %vm114_vm1, %v137_v53, %v133_v58 }
  0xad   :  { %v78_v52 = vmul.f32 0.00390625, %v59_v50  ;;  %v115_v10 = vsel %vm114_vm1, %v113_v55, %v108_v62 }
  0xae   :  { %v142_v56 = vrot.slane %v82_v49, %v119_v45 }
  0xaf   :  { %v74_v57 = vpop.xlane.xlu1 %73  ;;  %v120_v59 = vrot.slane %v78_v52, %v119_v45 }
  0xb0   :  { %v83_v60 = vmul.f32 0.00390625, %v74_v57  ;;  %v62_v61 = vpop.xlane.xlu0 %61  ;;  %v143_v11 = vsel %vm121_vm2, %v142_v56, %v138_v3 }
  0xb1   :  { %v79_v63 = vmul.f32 0.00390625, %v62_v61  ;;  %v122_v17 = vsel %vm121_vm2, %v120_v59, %v115_v10 }
  0xb2   :  { %v147_v7 = vrot.slane %v83_v60, %v126_v54 }
  0xb3   :  { %v127_v16 = vrot.slane %v79_v63, %v126_v54 }
  0xb4   :  { %v148_v22 = vsel %vm128_vm3, %v147_v7, %v143_v11 }
  0xb5   :  { %v129_v23 = vsel %vm128_vm3, %v127_v16, %v122_v17 }
  0xb6   :  { %v150_v24 = vsel %vm149_vm4, %v148_v22, %v129_v23 }
  0xb7   :  { %418 = vmatmul.mubr.msk.f32.vlgmr.msra.gmra.mrb[0].mxu0 %vm151_vm5, %v150_v24 }
 0x18a   :  { %v220_v27 = vpop.f32.mrb[0].mxu0 }
 0x18b   :  { %v221_v28 = vadd.f32 %v398_v26, %v220_v27  ;;  %v419_v29 = vpop.f32.mrb[1].mxu0 }
 0x18d   :  { %v224_v30 = vmax.f32 %v221_v28, 0.0 }
 0x18f   :  { %423 = vmatmul.mubr.msk.f32.vlgmr.msra.gmra.mrb[0].mxu1 %vm233_vm6, %v224_v30 }
 0x262   :  { %v303_v32 = vpop.f32.mrb[0].mxu1 }
 0x263   :  { %v304_v33 = vadd.f32 %v400_v31, %v303_v32  ;;  %v424_v34 = vpop.f32.mrb[1].mxu1 }
 0x265   :  { %v307_v35 = vadd.f32 3.0, %v304_v33 }
 0x267   :  { %v308_v36 = vmax.f32 %v307_v35, 0.0 }
 0x269   :  { %v309_v37 = vmin.f32 %v308_v36, 6.0 }
 0x26b   :  { %v310_v40 = vmul.f32 0.16666667, %v309_v37 }
 0x26d   :  { %v314_v41 = vrot.slane %v310_v40, %v313_v38  ;;  %v333_v43 = vrot.slane %v310_v40, %v332_v42 }
 0x26f   :  { %320 = vbcast.lane.b32.xlu1 %v314_v41, 264  ;;  %316 = vbcast.lane.b32.xlu0 %v314_v41, 256 }
 0x273   :  { %324 = vbcast.lane.b32.xlu1 %v314_v41, 272  ;;  %335 = vbcast.lane.b32.xlu0 %v333_v43, 256 }
 0x277   :  { %328 = vbcast.lane.b32.xlu1 %v314_v41, 280  ;;  %343 = vbcast.lane.b32.xlu0 %v333_v43, 272 }
 0x27b   :  { %339 = vbcast.lane.b32.xlu1 %v333_v43, 264 }
 0x27f   :  { %347 = vbcast.lane.b32.xlu1 %v333_v43, 280 }
 0x2e1   :  { %v321_v44 = vpop.permute.xlu1 %320  ;;  %v317_v45 = vpop.permute.xlu0 %316 }
 0x2e2   :  { %v351_v46 = vmul.f32 %v321_v44, %v554_v8  ;;  %v352_v47 = vmul.f32 %v321_v44, %v556_v9  ;;  %v349_v48 = vmul.f32 %v317_v45, %v542_v2  ;;  %v350_v49 = vmul.f32 %v317_v45, %v546_v4 }
 0x2e4   :  { %367 = vst [vmem:[#allocation5 + $0x10] sm:$0xff] %v351_v46  ;;  %368 = vst [vmem:[#allocation5 + $0x18] sm:$0xff] %v352_v47 }
 0x2e5   :  { %365 = vst [vmem:[#allocation5] sm:$0xff] %v349_v48  ;;  %366 = vst [vmem:[#allocation5 + $0x8] sm:$0xff] %v350_v49  ;;  %v325_v39 = vpop.permute.xlu1 %324  ;;  %v336_v50 = vpop.permute.xlu0 %335 }
 0x2e6   :  { %v353_v51 = vmul.f32 %v325_v39, %v566_v14  ;;  %v354_v52 = vmul.f32 %v325_v39, %v568_v15  ;;  %v357_v53 = vmul.f32 %v336_v50, %v538_v0  ;;  %v358_v8 = vmul.f32 %v336_v50, %v540_v1 }
 0x2e8   :  { %369 = vst [vmem:[#allocation5 + $0x20] sm:$0xff] %v353_v51  ;;  %370 = vst [vmem:[#allocation5 + $0x28] sm:$0xff] %v354_v52 }
 0x2e9   :  { %373 = vst [vmem:[#allocation5 + $0x40] sm:$0xff] %v357_v53  ;;  %374 = vst [vmem:[#allocation5 + $0x48] sm:$0xff] %v358_v8  ;;  %v329_v2 = vpop.permute.xlu1 %328  ;;  %v344_v4 = vpop.permute.xlu0 %343 }
 0x2ea   :  { %v355_v9 = vmul.f32 %v329_v2, %v578_v20  ;;  %v356_v54 = vmul.f32 %v329_v2, %v580_v21  ;;  %v361_v55 = vmul.f32 %v344_v4, %v562_v12  ;;  %v362_v14 = vmul.f32 %v344_v4, %v564_v13 }
 0x2ec   :  { %371 = vst [vmem:[#allocation5 + $0x30] sm:$0xff] %v355_v9  ;;  %372 = vst [vmem:[#allocation5 + $0x38] sm:$0xff] %v356_v54 }
 0x2ed   :  { %377 = vst [vmem:[#allocation5 + $0x60] sm:$0xff] %v361_v55  ;;  %378 = vst [vmem:[#allocation5 + $0x68] sm:$0xff] %v362_v14  ;;  %v340_v0 = vpop.permute.xlu1 %339 }
 0x2ee   :  { %v359_v1 = vmul.f32 %v340_v0, %v548_v5  ;;  %v360_v15 = vmul.f32 %v340_v0, %v550_v6 }
 0x2f0   :  { %375 = vst [vmem:[#allocation5 + $0x50] sm:$0xff] %v359_v1  ;;  %376 = vst [vmem:[#allocation5 + $0x58] sm:$0xff] %v360_v15 }
 0x2f1   :  { %v348_v20 = vpop.permute.xlu1 %347 }
 0x2f2   :  { %v363_v21 = vmul.f32 %v348_v20, %v574_v18  ;;  %v364_v12 = vmul.f32 %v348_v20, %v576_v19 }
 0x2f4   :  { %379 = vst [vmem:[#allocation5 + $0x70] sm:$0xff] %v363_v21  ;;  %380 = vst [vmem:[#allocation5 + $0x78] sm:$0xff] %v364_v12 }
 0x2f5   :  { %471 = shalt.err (!%p468_p12)
}
 0x2f6   :  { %s472_s21 = scalar_lea.hbm %s651_s5, 2048 }
 0x2f7   :  { %p473_p13 = scmp.ne.s32.totalorder %s651_s5, %s472_s21  ;;  %p476_p0 = scmp.lt.u32.totalorder %s472_s21, %s651_s5 }
 0x2f9   :  { %p478_p1 = pnand %p476_p0, %p473_p13 }
 0x2fb   :  { %481 = shalt.err (!%p478_p1)
}
 0x2fc   :  { %392 = dma.vmem_to_hbm [thread:$0]  %s387_s3, 2048, %s651_s5, [#allocation4], %s487_s28, %s487_s28, %s488_s29  }
 0x2fd   :  { %484 = dma.done.wait [#allocation4], 2048  }
 0x2fe   :  { %485 = vsyncadd [#allocation4], 4294965248 }
 0x2ff   :  { %396 = vsyncpa [#allocation3], 1 }
 0x300   :  { %397 = vsyncpa [#allocation4], 1 }

</bundles_post_ra>
